<compile_context>
chip_gen: v7x
topology: tpu7x:2x2x1
jax: 0.10.0
libtpu: 0.0.40
codegen_flags: <defaults>
</compile_context>

<pallas_src>
import functools

import numpy as np
import jax
import jax.numpy as jnp
from jax.experimental import pallas as pl
from jax.experimental.pallas import tpu as pltpu

# ---- static config (small, Flux-like; real Flux: 256 / 3072 / 768 / (16, 56, 56)) --------
NUM_SIN_CHANNELS = 256          # sinusoidal timestep/guidance projection width
EMBED_DIM = 32                  # temb width (Flux: 3072)
POOLED_DIM = 24                 # pooled text projection input dim (Flux: 768)
AXES_DIM = (8, 12, 12)          # rotary dims per id axis (Flux: (16, 56, 56))
ROPE_DIM = sum(AXES_DIM)
ROPE_THETA = 10000.0
MAX_PERIOD = 10000.0

VMEM_LIMIT_BYTES = 32 * 1024 * 1024      # explicit scoped-VMEM limit (safe on v5e/v6e/v7x)
PIPELINE_VMEM_BUDGET = 12 * 1024 * 1024  # budget used to size double-buffered tiles

# TODO(synk): guidance=None branch (CombinedTimestepTextProjEmbeddings) not emitted; this
# implements the guidance-present (Flux-dev) path only.
# x_embedder / context_embedder are held by the wrapper but unused in its forward.


# ================================ Pallas kernels ============================
def temb_kernel(t_ref, g_ref, pooled_ref, freq_ref,
                w1_ref, b1_ref, w2_ref, b2_ref,
                temb_ref, acc_ref, *, num_channels):
    """Fused CombinedTimestepGuidanceTextProjEmbeddings.

    x_cat = [sinusoid(t*1000) | sinusoid(g*1000) | pooled]  (K = 2*256 + P)
    h     = silu(x_cat @ W1_blockdiag + b1)                 (branch-hidden, tiled by the grid)
    temb  = h @ W2_stacked + b2                             (exact fusion of the 3 branches)
    """
    half = num_channels // 2
    step = pl.program_id(0)

    @pl.when(step == 0)
    def _():
        acc_ref[...] = jnp.zeros_like(acc_ref)

    freq = freq_ref[...]                                    # (1, num_channels), host-built

    def sinusoid(x):                                        # x: (B, 1) f32, already *1000
        arg = x * freq                                      # (B, num_channels)
        # flip_sin_to_cos=True  =>  [cos | sin]; halves are 128-lane aligned static slices
        return jnp.concatenate([jnp.cos(arg[:, :half]), jnp.sin(arg[:, half:])], axis=-1)

    t_sin = sinusoid(t_ref[...].astype(jnp.float32) * 1000.0)
    g_sin = sinusoid(g_ref[...].astype(jnp.float32) * 1000.0)
    x_cat = jnp.concatenate([t_sin, g_sin, pooled_ref[...].astype(jnp.float32)], axis=-1)

    # bf16 matmuls, f32 accumulation
    h = jnp.dot(x_cat.astype(w1_ref.dtype), w1_ref[...],
                preferred_element_type=jnp.float32) + b1_ref[...]
    h = h * jax.nn.sigmoid(h)                               # SiLU
    acc_ref[...] += jnp.dot(h.astype(w2_ref.dtype), w2_ref[...],
                            preferred_element_type=jnp.float32)

    @pl.when(step == pl.num_programs(0) - 1)
    def _():
        temb_ref[...] = (acc_ref[...] + b2_ref[...]).astype(temb_ref.dtype)


def rope_kernel(ids_ref, freq2_ref, phase_ref, dup_ref, out_ref):
    """FluxPosEmbed rotary cos/sin, lane-dense fused output [cos | sin].

    freq2 = [f | f] where f is the half-width per-axis table of DISTINCT frequencies;
    phase = [0 | -pi/2] so a single cos() evaluates both the cos and sin halves;
    dup is a constant 0/1 matrix that applies repeat_interleave(2) and packs the result
    as [cos_full | sin_full] in one lane-dense store (exact: single 1.0 term per output).
    """
    ids = ids_ref[...].astype(jnp.float32)                  # (B, T, n_axes)
    freq2 = freq2_ref[...]                                  # (n_axes, R)
    phase = phase_ref[...]                                  # (1, R)
    dup = dup_ref[...]                                      # (R, 2R)
    Bc, T, n_axes = ids.shape
    R = freq2.shape[-1]

    arg = ids[..., 0:1] * freq2[0:1, :] + phase             # (B, T, R)
    for i in range(1, n_axes):                              # static unroll over the 3 id axes
        arg = arg + ids[..., i:i + 1] * freq2[i:i + 1, :]

    cs = jnp.cos(arg)                                       # [cos(a) | cos(a - pi/2) = sin(a)]
    packed = jnp.dot(cs.reshape(Bc * T, R), dup,
                     preferred_element_type=jnp.float32)    # (B*T, 2R) on the idle MXU
    out_ref[...] = packed.reshape(Bc, T, dup.shape[-1]).astype(out_ref.dtype)


# ================================ host-side tables ==========================
def _build_rope_tables(axes_dim, theta):
    """Half-width frequency table + phase row + pair-duplication/packing matrix."""
    R = sum(axes_dim)
    Hh = R // 2
    fh = np.zeros((len(axes_dim), Hh), np.float32)
    off = 0
    for i, d in enumerate(axes_dim):
        assert d % 2 == 0
        m = np.arange(d // 2)
        fh[i, off:off + d // 2] = (1.0 / (theta ** ((2.0 * m) / d))).astype(np.float32)
        off += d // 2
    freq2 = np.concatenate([fh, fh], axis=1)                                # (n_axes, R)
    phase = np.concatenate([np.zeros(Hh, np.float32),
                            np.full(Hh, -np.pi / 2, np.float32)])[None, :]  # (1, R)
    dup = np.zeros((R, 2 * R), np.float32)
    for m in range(Hh):
        dup[m, 2 * m] = 1.0
        dup[m, 2 * m + 1] = 1.0
        dup[Hh + m, R + 2 * m] = 1.0
        dup[Hh + m, R + 2 * m + 1] = 1.0
    return jnp.asarray(freq2), jnp.asarray(phase), jnp.asarray(dup)


def build_freq_table(axes_dim, theta):
    """Full-width table with repeat_interleave(2) baked in (used by the pure-JAX reference)."""
    d_total = sum(axes_dim)
    ft = np.zeros((len(axes_dim), d_total), dtype=np.float32)
    off = 0
    for i, d in enumerate(axes_dim):
        k = np.arange(d)
        ft[i, off:off + d] = (1.0 / (theta ** ((2.0 * (k // 2)) / d))).astype(np.float32)
        off += d
    return jnp.asarray(ft)


# ================================ params ====================================
def init_params(key):
    ks = jax.random.split(key, 6)

    def lin(k, fin, fout, scale=None):
        scale = scale if scale is not None else 1.0 / np.sqrt(fin)
        kw, kb = jax.random.split(k)
        w = jax.random.normal(kw, (fin, fout), jnp.float32) * scale
        b = jax.random.normal(kb, (1, fout), jnp.float32) * 0.01
        return w, b

    wt1, bt1 = lin(ks[0], NUM_SIN_CHANNELS, EMBED_DIM)
    wt2, bt2 = lin(ks[1], EMBED_DIM, EMBED_DIM)
    wg1, bg1 = lin(ks[2], NUM_SIN_CHANNELS, EMBED_DIM)
    wg2, bg2 = lin(ks[3], EMBED_DIM, EMBED_DIM)
    wp1, bp1 = lin(ks[4], POOLED_DIM, EMBED_DIM)
    wp2, bp2 = lin(ks[5], EMBED_DIM, EMBED_DIM)
    return dict(wt1=wt1, bt1=bt1, wt2=wt2, bt2=bt2,
                wg1=wg1, bg1=bg1, wg2=wg2, bg2=bg2,
                wp1=wp1, bp1=bp1, wp2=wp2, bp2=bp2,
                freq_table=build_freq_table(AXES_DIM, ROPE_THETA))


def prepare_kernel_params(p, weight_dtype=jnp.bfloat16):
    """Fuse the three temb MLPs into two (bf16) matmuls and build host rope tables."""
    E, C, P = EMBED_DIM, NUM_SIN_CHANNELS, POOLED_DIM
    K1, H = 2 * C + P, 3 * E
    # block-diagonal first layer:  [sin(t) | sin(g) | pooled] -> [h_t | h_g | h_p]
    w1 = jnp.zeros((K1, H), jnp.float32)
    w1 = w1.at[0:C, 0:E].set(p["wt1"])
    w1 = w1.at[C:2 * C, E:2 * E].set(p["wg1"])
    w1 = w1.at[2 * C:, 2 * E:].set(p["wp1"])
    b1 = jnp.concatenate([p["bt1"], p["bg1"], p["bp1"]], axis=-1)           # (1, 3E)
    # stacked second layer:  out = h_cat @ [wt2; wg2; wp2] + (bt2 + bg2 + bp2)  (exact)
    w2 = jnp.concatenate([p["wt2"], p["wg2"], p["wp2"]], axis=0)            # (3E, E)
    b2 = p["bt2"] + p["bg2"] + p["bp2"]                                     # (1, E)
    # hoisted sinusoidal frequencies (same values on the cos and sin halves)
    half = C // 2
    freqs = jnp.exp(-jnp.log(MAX_PERIOD) * jnp.arange(half, dtype=jnp.float32) / half)
    sin_freq = jnp.concatenate([freqs, freqs])[None, :]                     # (1, C)
    rope_freq2, rope_phase, rope_dup = _build_rope_tables(AXES_DIM, ROPE_THETA)
    return dict(w1=w1.astype(weight_dtype), b1=b1,
                w2=w2.astype(weight_dtype), b2=b2,
                sin_freq=sin_freq,
                rope_freq2=rope_freq2, rope_phase=rope_phase, rope_dup=rope_dup)


# ================================ tile sizing ===============================
def _pick_seq_tile(S, B, out_width, vmem_budget_bytes):
    """Largest sequence tile (multiple of 8 dividing S, or S itself) whose in+out blocks,
    double-buffered in f32, fit the VMEM budget."""
    bytes_per_row = B * (out_width + 3) * 4 * 2
    cap = max(8, vmem_budget_bytes // max(bytes_per_row, 1))
    if cap >= S:
        return S
    t = (cap // 8) * 8
    while t >= 8:
        if S % t == 0:
            return t
        t -= 8
    return S


def _pick_hidden_tile(H, K1, E, vmem_budget_bytes):
    """Largest branch-hidden tile (multiple of 128 dividing H, or H) whose bf16 weight
    blocks, double-buffered, fit the VMEM budget."""
    def fits(t):
        return 2 * 2 * t * (K1 + E) <= vmem_budget_bytes
    if fits(H):
        return H
    t = (H // 128) * 128
    while t >= 128:
        if H % t == 0 and fits(t):
            return t
        t -= 128
    return H


# ================================ forward ===================================
def transformer_embedder_forward(kparams, hidden_states, timestep, guidance,
                                 pooled_projections, txt_ids, img_ids):
    dtype = hidden_states.dtype
    B = timestep.shape[0]
    t = timestep.astype(dtype).reshape(B, 1)
    g = guidance.astype(dtype).reshape(B, 1)

    # ---- temb: fused 2-matmul MLP, branch-hidden dim tiled as a reduction grid axis ----
    K1 = 2 * NUM_SIN_CHANNELS + POOLED_DIM
    H = 3 * EMBED_DIM
    tile_h = _pick_hidden_tile(H, K1, EMBED_DIM, PIPELINE_VMEM_BUDGET)

    temb = pl.pallas_call(
        functools.partial(temb_kernel, num_channels=NUM_SIN_CHANNELS),
        out_shape=jax.ShapeDtypeStruct((B, EMBED_DIM), dtype),
        grid=(H // tile_h,),
        in_specs=[
            pl.BlockSpec((B, 1), lambda h: (0, 0)),                    # t
            pl.BlockSpec((B, 1), lambda h: (0, 0)),                    # g
            pl.BlockSpec((B, POOLED_DIM), lambda h: (0, 0)),           # pooled
            pl.BlockSpec((1, NUM_SIN_CHANNELS), lambda h: (0, 0)),     # sinusoid freqs
            pl.BlockSpec((K1, tile_h), lambda h: (0, h)),              # fused W1 (block-diag)
            pl.BlockSpec((1, tile_h), lambda h: (0, h)),               # fused b1
            pl.BlockSpec((tile_h, EMBED_DIM), lambda h: (h, 0)),       # fused W2 (stacked)
            pl.BlockSpec((1, EMBED_DIM), lambda h: (0, 0)),            # fused b2 (summed)
        ],
        out_specs=pl.BlockSpec((B, EMBED_DIM), lambda h: (0, 0)),
        scratch_shapes=[pltpu.VMEM((B, EMBED_DIM), jnp.float32)],
        compiler_params=pltpu.CompilerParams(
            dimension_semantics=("arbitrary",),
            vmem_limit_bytes=VMEM_LIMIT_BYTES),
    )(t, g, pooled_projections.astype(dtype),
      kparams["sin_freq"], kparams["w1"], kparams["b1"],
      kparams["w2"], kparams["b2"])

    # ---- rotary embeddings: VMEM-budgeted sequence tiles, single fused [cos|sin] output ----
    ids = jnp.concatenate([txt_ids, img_ids], axis=1).astype(jnp.float32)   # (B, S, 3)
    S = ids.shape[1]
    n_axes = len(AXES_DIM)
    tile_s = _pick_seq_tile(S, B, 2 * ROPE_DIM, PIPELINE_VMEM_BUDGET)

    cos_sin = pl.pallas_call(
        rope_kernel,
        out_shape=jax.ShapeDtypeStruct((B, S, 2 * ROPE_DIM), jnp.float32),
        grid=(S // tile_s,),
        in_specs=[pl.BlockSpec((B, tile_s, n_axes), lambda s: (0, s, 0)),
                  pl.BlockSpec((n_axes, ROPE_DIM), lambda s: (0, 0)),
                  pl.BlockSpec((1, ROPE_DIM), lambda s: (0, 0)),
                  pl.BlockSpec((ROPE_DIM, 2 * ROPE_DIM), lambda s: (0, 0))],
        out_specs=pl.BlockSpec((B, tile_s, 2 * ROPE_DIM), lambda s: (0, s, 0)),
        compiler_params=pltpu.CompilerParams(
            dimension_semantics=("parallel",),
            vmem_limit_bytes=VMEM_LIMIT_BYTES),
    )(ids, kparams["rope_freq2"], kparams["rope_phase"], kparams["rope_dup"])

    cos = cos_sin[..., :ROPE_DIM]
    sin = cos_sin[..., ROPE_DIM:]
    return hidden_states, temb, (cos, sin)


# ================================ pure-JAX reference ========================
def _reference(params, hidden_states, timestep, guidance, pooled, txt_ids, img_ids):
    dtype = hidden_states.dtype
    half = NUM_SIN_CHANNELS // 2
    freqs = jnp.exp(-jnp.log(MAX_PERIOD) * jnp.arange(half, dtype=jnp.float32) / half)

    def sinusoid(x):  # (B,)
        arg = x[:, None].astype(jnp.float32) * freqs[None, :]
        return jnp.concatenate([jnp.cos(arg), jnp.sin(arg)], axis=-1)  # flip_sin_to_cos

    def mlp(x, w1, b1, w2, b2):
        h = x @ w1 + b1
        h = h * jax.nn.sigmoid(h)
        return h @ w2 + b2

    t = timestep.astype(dtype) * 1000.0
    g = guidance.astype(dtype) * 1000.0
    temb = (mlp(sinusoid(t), params["wt1"], params["bt1"], params["wt2"], params["bt2"])
            + mlp(sinusoid(g), params["wg1"], params["bg1"], params["wg2"], params["bg2"])
            + mlp(pooled.astype(jnp.float32), params["wp1"], params["bp1"],
                  params["wp2"], params["bp2"])).astype(dtype)

    ids = jnp.concatenate([txt_ids, img_ids], axis=1).astype(jnp.float32)
    arg = jnp.einsum("bsi,id->bsd", ids, params["freq_table"])
    return hidden_states, temb, (jnp.cos(arg), jnp.sin(arg))


# ==================================== main ==================================
if __name__ == "__main__":
    key = jax.random.PRNGKey(0)
    k_param, k_h, k_t, k_p = jax.random.split(key, 4)

    B, S_TXT, S_IMG, HIDDEN_C = 2, 8, 8, 32
    hidden_states = jax.random.normal(k_h, (B, S_IMG, HIDDEN_C), jnp.float32)
    timestep = jax.random.uniform(k_t, (B,), jnp.float32)                 # in [0, 1)
    guidance = jnp.full((B,), 3.5, jnp.float32)
    pooled_projections = jax.random.normal(k_p, (B, POOLED_DIM), jnp.float32)

    txt_ids = jnp.zeros((B, S_TXT, 3), jnp.float32)
    rows = (jnp.arange(S_IMG) // 4).astype(jnp.float32)
    cols = (jnp.arange(S_IMG) % 4).astype(jnp.float32)
    img_ids = jnp.broadcast_to(
        jnp.stack([jnp.zeros(S_IMG, jnp.float32), rows, cols], axis=-1)[None],
        (B, S_IMG, 3))

    raw_params = init_params(k_param)
    kernel_params = prepare_kernel_params(raw_params)

    out = transformer_embedder_forward(kernel_params, hidden_states, timestep, guidance,
                                       pooled_projections, txt_ids, img_ids)
    out = jax.block_until_ready(out)

    ref = _reference(raw_params, hidden_states, timestep, guidance,
                     pooled_projections, txt_ids, img_ids)
    hs_k, temb_k, (cos_k, sin_k) = out
    hs_r, temb_r, (cos_r, sin_r) = ref
    assert jnp.allclose(hs_k, hs_r)
    assert jnp.allclose(temb_k, temb_r, rtol=5e-2, atol=5e-2)
    assert jnp.allclose(cos_k, cos_r, rtol=1e-3, atol=1e-3)
    assert jnp.allclose(sin_k, sin_r, rtol=1e-3, atol=1e-3)

    print("KERNEL_OK")
</pallas_src>

<mosaic_0001>
module attributes {stable_mosaic.version = 11 : i64} {
  func.func @temb_kernel(%arg0: i32, %arg1: memref<2x1xf32, #tpu.memory_space<vmem>>, %arg2: memref<2x1xf32, #tpu.memory_space<vmem>>, %arg3: memref<2x24xf32, #tpu.memory_space<vmem>>, %arg4: memref<1x256xf32, #tpu.memory_space<vmem>>, %arg5: memref<536x96xbf16, #tpu.memory_space<vmem>>, %arg6: memref<1x96xf32, #tpu.memory_space<vmem>>, %arg7: memref<96x32xbf16, #tpu.memory_space<vmem>>, %arg8: memref<1x32xf32, #tpu.memory_space<vmem>>, %arg9: memref<2x32xf32, #tpu.memory_space<vmem>>, %arg10: memref<2x32xf32, #tpu.memory_space<vmem>>) attributes {dimension_semantics = [#tpu.dimension_semantics<arbitrary>], iteration_bounds = array<i64: 1>, scalar_prefetch = 0 : i64, scratch_operands = 1 : i64, tpu.core_type = #tpu.core_type<tc>, window_params = [{pipeline_mode = #tpu.pipeline_mode<synchronous>, transform_indices = @transform_0, window_bounds = array<i64: 2, 1>}, {pipeline_mode = #tpu.pipeline_mode<synchronous>, transform_indices = @transform_1, window_bounds = array<i64: 2, 1>}, {pipeline_mode = #tpu.pipeline_mode<synchronous>, transform_indices = @transform_2, window_bounds = array<i64: 2, 24>}, {pipeline_mode = #tpu.pipeline_mode<synchronous>, transform_indices = @transform_3, window_bounds = array<i64: 1, 256>}, {transform_indices = @transform_4, window_bounds = array<i64: 536, 96>}, {transform_indices = @transform_5, window_bounds = array<i64: 1, 96>}, {transform_indices = @transform_6, window_bounds = array<i64: 96, 32>}, {pipeline_mode = #tpu.pipeline_mode<synchronous>, transform_indices = @transform_7, window_bounds = array<i64: 1, 32>}, {pipeline_mode = #tpu.pipeline_mode<synchronous>, transform_indices = @transform_8, window_bounds = array<i64: 2, 32>}]} {
    %c0_i32 = arith.constant 0 : i32
    %0 = arith.cmpi eq, %arg0, %c0_i32 : i32
    %1 = arith.extui %0 : i1 to i32
    %c0_i32_0 = arith.constant 0 : i32
    %2 = arith.cmpi ne, %1, %c0_i32_0 : i32
    scf.if %2 {
      %cst_24 = arith.constant 0.000000e+00 : f32
      %49 = vector.broadcast %cst_24 : f32 to vector<2x32xf32>
      %c0_25 = arith.constant 0 : index
      %c0_26 = arith.constant 0 : index
      %50 = vector.load %arg10[%c0_25, %c0_26] : memref<2x32xf32, #tpu.memory_space<vmem>>, vector<2x32xf32>
      tpu.vector_store %arg10[%c0_25, %c0_26], %49 {strides = array<i32>} : memref<2x32xf32, #tpu.memory_space<vmem>>, vector<2x32xf32>,
    } else {
    }
    %c0 = arith.constant 0 : index
    %c0_1 = arith.constant 0 : index
    %3 = vector.load %arg4[%c0, %c0_1] : memref<1x256xf32, #tpu.memory_space<vmem>>, vector<1x256xf32>
    %c0_2 = arith.constant 0 : index
    %c0_3 = arith.constant 0 : index
    %4 = vector.load %arg1[%c0_2, %c0_3] : memref<2x1xf32, #tpu.memory_space<vmem>>, vector<2x1xf32>
    %cst = arith.constant 1.000000e+03 : f32
    %5 = vector.broadcast %cst : f32 to vector<2x1xf32>
    %6 = arith.mulf %4, %5 : vector<2x1xf32>
    %7 = vector.broadcast %6 : vector<2x1xf32> to vector<2x256xf32>
    %8 = vector.broadcast %3 : vector<1x256xf32> to vector<2x256xf32>
    %9 = arith.mulf %7, %8 : vector<2x256xf32>
    %10 = vector.extract_strided_slice %9 {offsets = [0, 0], sizes = [2, 128], strides = [1, 1]} : vector<2x256xf32> to vector<2x128xf32>
    %11 = math.cos %10 : vector<2x128xf32>
    %12 = vector.extract_strided_slice %9 {offsets = [0, 128], sizes = [2, 128], strides = [1, 1]} : vector<2x256xf32> to vector<2x128xf32>
    %13 = math.sin %12 : vector<2x128xf32>
    %14 = tpu.concatenate %11, %13 in 1 : vector<2x128xf32>, vector<2x128xf32> -> vector<2x256xf32>
    %c0_4 = arith.constant 0 : index
    %c0_5 = arith.constant 0 : index
    %15 = vector.load %arg2[%c0_4, %c0_5] : memref<2x1xf32, #tpu.memory_space<vmem>>, vector<2x1xf32>
    %cst_6 = arith.constant 1.000000e+03 : f32
    %16 = vector.broadcast %cst_6 : f32 to vector<2x1xf32>
    %17 = arith.mulf %15, %16 : vector<2x1xf32>
    %18 = vector.broadcast %17 : vector<2x1xf32> to vector<2x256xf32>
    %19 = vector.broadcast %3 : vector<1x256xf32> to vector<2x256xf32>
    %20 = arith.mulf %18, %19 : vector<2x256xf32>
    %21 = vector.extract_strided_slice %20 {offsets = [0, 0], sizes = [2, 128], strides = [1, 1]} : vector<2x256xf32> to vector<2x128xf32>
    %22 = math.cos %21 : vector<2x128xf32>
    %23 = vector.extract_strided_slice %20 {offsets = [0, 128], sizes = [2, 128], strides = [1, 1]} : vector<2x256xf32> to vector<2x128xf32>
    %24 = math.sin %23 : vector<2x128xf32>
    %25 = tpu.concatenate %22, %24 in 1 : vector<2x128xf32>, vector<2x128xf32> -> vector<2x256xf32>
    %c0_7 = arith.constant 0 : index
    %c0_8 = arith.constant 0 : index
    %26 = vector.load %arg3[%c0_7, %c0_8] : memref<2x24xf32, #tpu.memory_space<vmem>>, vector<2x24xf32>
    %27 = tpu.concatenate %14, %25, %26 in 1 : vector<2x256xf32>, vector<2x256xf32>, vector<2x24xf32> -> vector<2x536xf32>
    %28 = arith.truncf %27 : vector<2x536xf32> to vector<2x536xbf16>
    %c0_9 = arith.constant 0 : index
    %c0_10 = arith.constant 0 : index
    %29 = vector.load %arg5[%c0_9, %c0_10] : memref<536x96xbf16, #tpu.memory_space<vmem>>, vector<536x96xbf16>
    %cst_11 = arith.constant dense<0.000000e+00> : vector<2x96xf32>
    %30 = tpu.matmul %28, %29, %cst_11 {dimension_numbers = #tpu.dot_dimension_numbers<[1], [0], [0], [1], [0, 0, 1, 1], [], []>} : vector<2x536xbf16>, vector<536x96xbf16>, vector<2x96xf32> -> vector<2x96xf32>
    %c0_12 = arith.constant 0 : index
    %c0_13 = arith.constant 0 : index
    %31 = vector.load %arg6[%c0_12, %c0_13] : memref<1x96xf32, #tpu.memory_space<vmem>>, vector<1x96xf32>
    %32 = vector.broadcast %31 : vector<1x96xf32> to vector<2x96xf32>
    %33 = arith.addf %30, %32 : vector<2x96xf32>
    %34 = arith.negf %33 : vector<2x96xf32>
    %35 = math.exp %34 : vector<2x96xf32>
    %cst_14 = arith.constant 1.000000e+00 : f32
    %36 = vector.broadcast %cst_14 : f32 to vector<2x96xf32>
    %37 = arith.addf %36, %35 : vector<2x96xf32>
    %38 = arith.divf %36, %37 : vector<2x96xf32>
    %39 = arith.mulf %33, %38 : vector<2x96xf32>
    %c0_15 = arith.constant 0 : index
    %c0_16 = arith.constant 0 : index
    %40 = vector.load %arg10[%c0_15, %c0_16] : memref<2x32xf32, #tpu.memory_space<vmem>>, vector<2x32xf32>
    %41 = arith.truncf %39 : vector<2x96xf32> to vector<2x96xbf16>
    %c0_17 = arith.constant 0 : index
    %c0_18 = arith.constant 0 : index
    %42 = vector.load %arg7[%c0_17, %c0_18] : memref<96x32xbf16, #tpu.memory_space<vmem>>, vector<96x32xbf16>
    %cst_19 = arith.constant dense<0.000000e+00> : vector<2x32xf32>
    %43 = tpu.matmul %41, %42, %cst_19 {dimension_numbers = #tpu.dot_dimension_numbers<[1], [0], [0], [1], [0, 0, 1, 1], [], []>} : vector<2x96xbf16>, vector<96x32xbf16>, vector<2x32xf32> -> vector<2x32xf32>
    %44 = arith.addf %40, %43 : vector<2x32xf32>
    %c0_20 = arith.constant 0 : index
    %c0_21 = arith.constant 0 : index
    %45 = vector.load %arg10[%c0_20, %c0_21] : memref<2x32xf32, #tpu.memory_space<vmem>>, vector<2x32xf32>
    tpu.vector_store %arg10[%c0_20, %c0_21], %44 {strides = array<i32>} : memref<2x32xf32, #tpu.memory_space<vmem>>, vector<2x32xf32>,
    %c0_i32_22 = arith.constant 0 : i32
    %46 = arith.cmpi eq, %arg0, %c0_i32_22 : i32
    %47 = arith.extui %46 : i1 to i32
    %c0_i32_23 = arith.constant 0 : i32
    %48 = arith.cmpi ne, %47, %c0_i32_23 : i32
    scf.if %48 {
      %c0_24 = arith.constant 0 : index
      %c0_25 = arith.constant 0 : index
      %49 = vector.load %arg10[%c0_24, %c0_25] : memref<2x32xf32, #tpu.memory_space<vmem>>, vector<2x32xf32>
      %c0_26 = arith.constant 0 : index
      %c0_27 = arith.constant 0 : index
      %50 = vector.load %arg8[%c0_26, %c0_27] : memref<1x32xf32, #tpu.memory_space<vmem>>, vector<1x32xf32>
      %51 = vector.broadcast %50 : vector<1x32xf32> to vector<2x32xf32>
      %52 = arith.addf %49, %51 : vector<2x32xf32>
      %c0_28 = arith.constant 0 : index
      %c0_29 = arith.constant 0 : index
      %53 = vector.load %arg9[%c0_28, %c0_29] : memref<2x32xf32, #tpu.memory_space<vmem>>, vector<2x32xf32>
      tpu.vector_store %arg9[%c0_28, %c0_29], %52 {strides = array<i32>} : memref<2x32xf32, #tpu.memory_space<vmem>>, vector<2x32xf32>,
    } else {
    }
    return
  }
  func.func @transform_0(%arg0: i32) -> (i32, i32) {
    %c0_i32 = arith.constant 0 : i32
    %c0_i32_0 = arith.constant 0 : i32
    %c0_i32_1 = arith.constant 0 : i32
    return %c0_i32, %c0_i32_0 : i32, i32
  }
  func.func @transform_1(%arg0: i32) -> (i32, i32) {
    %c0_i32 = arith.constant 0 : i32
    %c0_i32_0 = arith.constant 0 : i32
    %c0_i32_1 = arith.constant 0 : i32
    return %c0_i32, %c0_i32_0 : i32, i32
  }
  func.func @transform_2(%arg0: i32) -> (i32, i32) {
    %c0_i32 = arith.constant 0 : i32
    %c0_i32_0 = arith.constant 0 : i32
    %c0_i32_1 = arith.constant 0 : i32
    return %c0_i32, %c0_i32_0 : i32, i32
  }
  func.func @transform_3(%arg0: i32) -> (i32, i32) {
    %c0_i32 = arith.constant 0 : i32
    %c0_i32_0 = arith.constant 0 : i32
    %c0_i32_1 = arith.constant 0 : i32
    return %c0_i32, %c0_i32_0 : i32, i32
  }
  func.func @transform_4(%arg0: i32) -> (i32, i32) {
    %c0_i32 = arith.constant 0 : i32
    %c0_i32_0 = arith.constant 0 : i32
    return %c0_i32, %arg0 : i32, i32
  }
  func.func @transform_5(%arg0: i32) -> (i32, i32) {
    %c0_i32 = arith.constant 0 : i32
    %c0_i32_0 = arith.constant 0 : i32
    return %c0_i32, %arg0 : i32, i32
  }
  func.func @transform_6(%arg0: i32) -> (i32, i32) {
    %c0_i32 = arith.constant 0 : i32
    %c0_i32_0 = arith.constant 0 : i32
    return %arg0, %c0_i32 : i32, i32
  }
  func.func @transform_7(%arg0: i32) -> (i32, i32) {
    %c0_i32 = arith.constant 0 : i32
    %c0_i32_0 = arith.constant 0 : i32
    %c0_i32_1 = arith.constant 0 : i32
    return %c0_i32, %c0_i32_0 : i32, i32
  }
  func.func @transform_8(%arg0: i32) -> (i32, i32) {
    %c0_i32 = arith.constant 0 : i32
    %c0_i32_0 = arith.constant 0 : i32
    %c0_i32_1 = arith.constant 0 : i32
    return %c0_i32, %c0_i32_0 : i32, i32
  }
}

</mosaic_0001>

<bundles_post_ra>
// kernel: tpu_custom_call.1
= control target key start
LH: loop header
LB: loop body
LE: loop exit
PB: predicated region body
PF: predicated region fallthrough
CT: control target
= control target key end

     0   :  { %v1271_v2 = vmov 0   ;;  %s1753_s0 = inlined_call_operand.vmem [shape: f32[2,1], index: 0, kind: input, shape index: {}]   ;;  %s1754_s1 = inlined_call_operand.vmem [shape: f32[2,1], index: 1, kind: input, shape index: {}]   ;;  %s1755_s2 = inlined_call_operand.vmem [shape: f32[2,24], index: 2, kind: input, shape index: {}]   ;;  %s1756_s3 = inlined_call_operand.vmem [shape: f32[1,256], index: 3, kind: input, shape index: {}]   ;;  %s1757_s4 = inlined_call_operand.vmem [shape: bf16[536,96], index: 4, kind: input, shape index: {}]   ;;  %s1758_s5 = inlined_call_operand.vmem [shape: f32[1,96], index: 5, kind: input, shape index: {}]   ;;  %s1759_s6 = inlined_call_operand.vmem [shape: bf16[96,32], index: 6, kind: input, shape index: {}]   ;;  %s1760_s7 = inlined_call_operand.vmem [shape: f32[1,32], index: 7, kind: input, shape index: {}]   ;;  %s1761_s8 = inlined_call_operand.hbm [shape: f32[2,32], index: 8, kind: output, shape index: {}]  }
   0x1   :  { %v38_v0 = vld [vmem:[%s1753_s0] sm:$0x3]  ;;  %1186 = vset.pattern.permute.xlu0 %v1271_v2 }
   0x2   :  { %v265_v1 = vld [vmem:[%s1754_s1] sm:$0x3]  ;;  %v39_v3 = vmul.f32 1000.0, %v38_v0 }
   0x3   :  { %v266_v4 = vmul.f32 1000.0, %v265_v1 }
   0x4   :  { %42 = vperm.xlu0 %1186, %v39_v3  }
   0x8   :  { %269 = vperm.xlu0 %1186, %v266_v4  }
   0x9   :  { %13 = vsyncpa [#allocation4], 0  ;;  %v1187_v5 = vld [vmem:[%s1757_s4 + $0x40] sm:$0xff]   ;;  %v1189_v7 = vld [vmem:[%s1757_s4 + $0x48] sm:$0xff]   ;;  %v46_v35 = vlaneseq  ;;  %v1272_v39 = vmov 0.0   ;;  %s1280_s18 = smov [#allocation3]  }
   0xa   :  { %v1188_v6 = vld [vmem:[%s1757_s4] sm:$0xff]   ;;  %1082 = vmatprep.subr.bf16.mxu0 %v1187_v5  ;;  %v1191_v9 = vld [vmem:[%s1757_s4 + $0x8] sm:$0xff]   ;;  %v1193_v11 = vld [vmem:[%s1757_s4 + $0x50] sm:$0xff]   ;;  %s1013_s19 = sshll.u32 %s1280_s18, 4  ;;  %s1014_s19 = int_to_ptr.vmem [resolvable:$true] %s1013_s19 }
   0xb   :  { %1083 = vmatpush3.bf16.msra.mxu0 %v1188_v6  ;;  %v1190_v8 = vld [vmem:[%s1757_s4 + $0xc0] sm:$0xff]   ;;  %v1194_v12 = vld [vmem:[%s1757_s4 + $0xc8] sm:$0xff]   ;;  %v1195_v13 = vld [vmem:[%s1757_s4 + $0x10] sm:$0xff]   ;;  %v47_v36 = vshrl.u32 %v46_v35, 7  ;;  %s1247_s20 = scalar_lea.vmem %s1014_s19, 32  ;;  %p1252_p1 = scmp.lt.s32.totalorder %s1014_s19, %s1014_s19 }
   0xc   :  { %v1192_v10 = vld [vmem:[%s1757_s4 + $0x80] sm:$0xff]   ;;  %1084 = vmatprep.subr.bf16.mxu0 %v1189_v7  ;;  %1104 = vmatprep.subr.bf16.mxu1 %v1190_v8  ;;  %v1196_v14 = vld [vmem:[%s1757_s4 + $0x88] sm:$0xff]   ;;  %v1197_v15 = vld [vmem:[%s1757_s4 + $0x58] sm:$0xff]   ;;  %p1248_p0 = scmp.ne.s32.totalorder %s1014_s19, %s1247_s20  ;;  %p1253_p2 = scmp.lt.s32.totalorder %s1247_s20, %s1247_s20 }
   0xd   :  { %1105 = vmatpush3.bf16.msra.mxu1 %v1192_v10  ;;  %v1198_v16 = vld [vmem:[%s1757_s4 + $0xd0] sm:$0xff]   ;;  %v1199_v17 = vld [vmem:[%s1757_s4 + $0x18] sm:$0xff]   ;;  %v1201_v19 = vld [vmem:[%s1757_s4 + $0x60] sm:$0xff]   ;;  %v48_v40 = vsub.s32 0, %v47_v36  ;;  %v52_v41 = vsub.s32 1, %v47_v36 }
   0xe   :  { %1106 = vmatprep.subr.bf16.mxu1 %v1194_v12  ;;  %v1200_v18 = vld [vmem:[%s1757_s4 + $0x90] sm:$0xff]   ;;  %v1202_v20 = vld [vmem:[%s1757_s4 + $0xd8] sm:$0xff]   ;;  %v1203_v21 = vld [vmem:[%s1757_s4 + $0x20] sm:$0xff]   ;;  %p1254_p3 = por %p1253_p2, %p1252_p1 }
   0xf   :  { %1085 = vmatpush3.bf16.msra.mxu0 %v1191_v9  ;;  %v1204_v22 = vld [vmem:[%s1757_s4 + $0x98] sm:$0xff]   ;;  %v1205_v23 = vld [vmem:[%s1757_s4 + $0x68] sm:$0xff]   ;;  %v1206_v24 = vld [vmem:[%s1757_s4 + $0xe0] sm:$0xff]  }
  0x10   :  { %1086 = vmatprep.subr.bf16.mxu0 %v1193_v11  ;;  %v1207_v25 = vld [vmem:[%s1757_s4 + $0x28] sm:$0xff]   ;;  %v1208_v26 = vld [vmem:[%s1757_s4 + $0xa0] sm:$0xff]   ;;  %v1209_v27 = vld [vmem:[%s1757_s4 + $0x70] sm:$0xff]   ;;  %p1255_p4 = pnand %p1254_p3, %p1248_p0 }
  0x11   :  { %1107 = vmatpush3.bf16.msra.mxu1 %v1196_v14  ;;  %v1210_v28 = vld [vmem:[%s1757_s4 + $0xe8] sm:$0xff]   ;;  %v1211_v29 = vld [vmem:[%s1757_s4 + $0x30] sm:$0xff]   ;;  %v1213_v31 = vld [vmem:[%s1757_s4 + $0x78] sm:$0xff]  }
  0x12   :  { %1108 = vmatprep.subr.bf16.mxu1 %v1198_v16  ;;  %v1212_v30 = vld [vmem:[%s1757_s4 + $0xa8] sm:$0xff]   ;;  %v1214_v32 = vld [vmem:[%s1757_s4 + $0xf0] sm:$0xff]   ;;  %v1215_v33 = vld [vmem:[%s1757_s4 + $0x38] sm:$0xff]  }
  0x13   :  { %1087 = vmatpush3.bf16.msra.mxu0 %v1195_v13  ;;  %v1216_v34 = vld [vmem:[%s1757_s4 + $0xb0] sm:$0xff]   ;;  %v1217_v37 = vld [vmem:[%s1757_s4 + $0xf8] sm:$0xff]   ;;  %v37_v42 = vld [vmem:[%s1756_s3] sm:$0x3] }
  0x14   :  { %1088 = vmatprep.subr.bf16.mxu0 %v1197_v15  ;;  %v1218_v38 = vld [vmem:[%s1757_s4 + $0xb8] sm:$0xff]   ;;  %v49_v43 = vrot.slane %v37_v42, %v48_v40  ;;  %v53_v44 = vrot.slane %v37_v42, %v52_v41  ;;  %v1273_v15 = vmov 683565275  }
  0x15   :  { %1109 = vmatpush3.bf16.msra.mxu1 %v1200_v18 }
  0x16   :  { %1110 = vmatprep.subr.bf16.mxu1 %v1202_v20 }
  0x17   :  { %1089 = vmatpush3.bf16.msra.mxu0 %v1199_v17  ;;  %v1274_v17 = vmov 2475754826  }
  0x18   :  { %1090 = vmatprep.subr.bf16.mxu0 %v1201_v19  ;;  %v1275_v19 = vmov 2131351028  }
  0x19   :  { %1111 = vmatpush3.bf16.msra.mxu1 %v1204_v22 }
  0x1a   :  { %1112 = vmatprep.subr.bf16.mxu1 %v1206_v24 }
  0x1b   :  { %1091 = vmatpush3.bf16.msra.mxu0 %v1203_v21  ;;  %v1276_v21 = vmov 2102212464  }
  0x1c   :  { %1092 = vmatprep.subr.bf16.mxu0 %v1205_v23 }
  0x1d   :  { %1113 = vmatpush3.bf16.msra.mxu1 %v1208_v26  ;;  %v1277_v26 = vmov 920167782  }
  0x1e   :  { %1114 = vmatprep.subr.bf16.mxu1 %v1210_v28 }
  0x1f   :  { %1093 = vmatpush3.bf16.msra.mxu0 %v1207_v25 }
  0x20   :  { %1094 = vmatprep.subr.bf16.mxu0 %v1209_v27 }
  0x21   :  { %1115 = vmatpush3.bf16.msra.mxu1 %v1212_v30  ;;  %v1278_v30 = vmov 1326507024  }
  0x22   :  { %1116 = vmatprep.subr.bf16.mxu1 %v1214_v32 }
  0x23   :  { %1095 = vmatpush3.bf16.msra.mxu0 %v1211_v29 }
  0x24   :  { %1096 = vmatprep.subr.bf16.mxu0 %v1213_v31 }
  0x25   :  { %1117 = vmatpush3.bf16.msra.mxu1 %v1216_v34 }
  0x26   :  { %1118 = vmatprep.subr.bf16.mxu1 %v1217_v37 }
  0x27   :  { %1097 = vmatpush3.bf16.msra.mxu0 %v1215_v33 }
  0x28   :  { %1136 = vmatprep.subr.bf16.mxu0 %v1272_v39 }
  0x29   :  { %1119 = vmatpush3.bf16.msra.mxu1 %v1218_v38 }
  0x2a   :  { %1144 = vmatprep.subr.bf16.mxu1 %v1272_v39 }
  0x83   :  { %v43_v45 = vpop.permute.xlu0 %42 }
  0x84   :  { %v1433_v46 = vmul.f32 %v49_v43, %v43_v45  ;;  %v1435_v47 = vmul.f32 %v53_v44, %v43_v45 }
  0x86   :  { %v58_v48 = vand.u32 2147483647, %v1433_v46  ;;  %v61_v49 = vand.u32 2139095040, %v1433_v46  ;;  %v164_v50 = vand.u32 2139095040, %v1435_v47  ;;  %v161_v10 = vand.u32 2147483647, %v1435_v47 }
  0x87   :  { %v270_v51 = vpop.permute.xlu0 %269 }
  0x88   :  { %v62_v52 = vshrl.u32 %v61_v49, 23  ;;  %v165_v53 = vshrl.u32 %v164_v50, 23  ;;  %v1440_v54 = vmul.f32 %v270_v51, %v49_v43  ;;  %v65_v55 = vand.u32 8388607, %v58_v48 }
  0x89   :  { %v1444_v56 = vmul.f32 %v270_v51, %v53_v44 }
  0x8a   :  { %v1021_v57 = vadd.s32 4294967169, %v62_v52  ;;  %v1025_v58 = vadd.s32 4294967169, %v165_v53  ;;  %v274_v59 = vand.u32 2147483647, %v1440_v54  ;;  %v277_v60 = vand.u32 2139095040, %v1440_v54 }
  0x8b   :  { %v66_v63 = vor.u32 8388608, %v65_v55  ;;  %v380_v1 = vand.u32 2139095040, %v1444_v56 }
  0x8c   :  { %v68_v61 = vadd.s32 1, %v1021_v57  ;;  %v171_v62 = vadd.s32 1, %v1025_v58  ;;  %v278_v0 = vshrl.u32 %v277_v60, 23  ;;  %v281_v2 = vand.u32 8388607, %v274_v59 }
  0x8d   :  { %v1453_v8 = vshll.u32 %v66_v63, 8  ;;  %v381_v9 = vshrl.u32 %v380_v1, 23 }
  0x8e   :  { %vm69_vm0 = vcmp.gt.s32.totalorder %v68_v61, 0  ;;  %vm172_vm1 = vcmp.gt.s32.totalorder %v171_v62, 0  ;;  %v1029_v5 = vadd.s32 4294967169, %v278_v0  ;;  %v282_v13 = vor.u32 8388608, %v281_v2 }
  0x8f   :  { %v70_v3 = vsel %vm69_vm0, %v68_v61, 0  ;;  %v1451_v4 = vsel %vm172_vm1, %v171_v62, 0  ;;  %v1033_v2 = vadd.s32 4294967169, %v381_v9 }
  0x90   :  { %v72_v6 = vand.u32 31, %v70_v3  ;;  %v71_v7 = vshrl.u32 %v70_v3, 5  ;;  %v1457_v12 = vand.u32 31, %v1451_v4  ;;  %v284_v14 = vadd.s32 1, %v1029_v5 }
  0x91   :  { %v1470_v51 = vshll.u32 %v282_v13, 8 }
  0x92   :  { %v73_v11 = vsub.s32 32, %v72_v6  ;;  %v75_v16 = vshll.u32 %v1273_v15, %v72_v6  ;;  %v78_v18 = vshll.u32 %v1274_v17, %v72_v6  ;;  %v81_v20 = vshll.u32 %v1275_v19, %v72_v6 }
  0x93   :  { %v84_v22 = vshll.u32 %v1276_v21, %v72_v6  ;;  %v87_v27 = vshll.u32 %v1277_v26, %v72_v6  ;;  %vm90_vm2 = vcmp.lt.s32.totalorder %v71_v7, 1  ;;  %vm92_vm3 = vcmp.lt.s32.totalorder %v71_v7, 3 }
  0x94   :  { %v76_v23 = vshrl.u32 %v1274_v17, %v73_v11  ;;  %v79_v24 = vshrl.u32 %v1275_v19, %v73_v11  ;;  %v82_v25 = vshrl.u32 %v1276_v21, %v73_v11  ;;  %v74_v28 = vshrl.u32 %v1273_v15, %v73_v11 }
  0x95   :  { %v85_v29 = vshrl.u32 %v1277_v26, %v73_v11  ;;  %v88_v31 = vshrl.u32 %v1278_v30, %v73_v11  ;;  %vm93_vm4 = vcmp.lt.s32.totalorder %v71_v7, 4  ;;  %vm285_vm5 = vcmp.gt.s32.totalorder %v284_v14, 0 }
  0x96   :  { %v77_v32 = vor.u32 %v76_v23, %v75_v16  ;;  %v80_v33 = vor.u32 %v79_v24, %v78_v18  ;;  %v83_v34 = vor.u32 %v82_v25, %v81_v20  ;;  %v286_v45 = vsel %vm285_vm5, %v284_v14, 0 }
  0x97   :  { %v86_v35 = vor.u32 %v85_v29, %v84_v22  ;;  %v89_v36 = vor.u32 %v88_v31, %v87_v27  ;;  %vm91_vm6 = vcmp.lt.s32.totalorder %v71_v7, 2  ;;  %v288_v57 = vand.u32 31, %v286_v45 }
  0x98   :  { %v94_v37 = vsel %vm90_vm2, %v74_v28, %v77_v32  ;;  %v95_v38 = vsel %vm93_vm4, %v83_v34, 2102212464  ;;  %v98_v40 = vsel %vm90_vm2, %v77_v32, %v80_v33  ;;  %v102_v41 = vsel %vm90_vm2, %v80_v33, %v83_v34 }
  0x99   :  { %v96_v42 = vsel %vm92_vm3, %v80_v33, %v95_v38  ;;  %v99_v43 = vsel %vm93_vm4, %v86_v35, 920167782  ;;  %v103_v44 = vsel %vm93_vm4, %v89_v36, 1326507024  ;;  %v1482_v63 = vsub.s32 32, %v1457_v12 }
  0x9a   :  { %v100_v49 = vsel %vm92_vm3, %v83_v34, %v99_v43  ;;  %v104_v50 = vsel %vm92_vm3, %v86_v35, %v103_v44  ;;  %v97_v52 = vsel %vm91_vm6, %v94_v37, %v96_v42  ;;  %v287_v0 = vshrl.u32 %v286_v45, 5 }
  0x9b   :  { %v101_v53 = vsel %vm91_vm6, %v98_v40, %v100_v49  ;;  %v105_v55 = vsel %vm91_vm6, %v102_v41, %v104_v50  ;;  %v289_v1 = vsub.s32 32, %v288_v57  ;;  %v113_v3 = vmul.u32 %v1453_v8, %v97_v52 }
  0x9c   :  { %v1473_v58 = vmul.u32.u64.low %v1453_v8, %v105_v55  ;;  %v1474_v60 = vmul.u32.u64.high %v1453_v8, %v105_v55, %v1473_v58  ;;  %v1477_v61 = vmul.u32.u64.low %v1453_v8, %v101_v53  ;;  %v1478_v62 = vmul.u32.u64.high %v1453_v8, %v101_v53, %v1477_v61 }
  0x9d   :  { %v291_v5 = vshll.u32 %v1273_v15, %v288_v57  ;;  %v294_v6 = vshll.u32 %v1274_v17, %v288_v57  ;;  %v297_v7 = vshll.u32 %v1275_v19, %v288_v57  ;;  %v292_v11 = vshrl.u32 %v1274_v17, %v289_v1 }
  0x9e   :  { %v295_v13 = vshrl.u32 %v1275_v19, %v289_v1  ;;  %v298_v14 = vshrl.u32 %v1276_v21, %v289_v1  ;;  %v300_v16 = vshll.u32 %v1276_v21, %v288_v57  ;;  %vm115_vm7 = vc.u32 %v1474_v60, %v1477_v61 }
  0x9f   :  { %v116_v9 = vadd.s32 1, %v1478_v62  ;;  %v301_v8 = vshrl.u32 %v1277_v26, %v289_v1  ;;  %v303_v18 = vshll.u32 %v1277_v26, %v288_v57  ;;  %v293_v20 = vor.u32 %v292_v11, %v291_v5 }
  0xa0   :  { %v296_v22 = vor.u32 %v295_v13, %v294_v6  ;;  %v299_v23 = vor.u32 %v298_v14, %v297_v7  ;;  %v304_v24 = vshrl.u32 %v1278_v30, %v289_v1  ;;  %vm306_vm8 = vcmp.lt.s32.totalorder %v287_v0, 1 }
  0xa1   :  { %v117_v25 = vsel %vm115_vm7, %v116_v9, %v1478_v62  ;;  %v302_v27 = vor.u32 %v301_v8, %v300_v16  ;;  %vm309_vm9 = vcmp.lt.s32.totalorder %v287_v0, 4  ;;  %v290_v29 = vshrl.u32 %v1273_v15, %v289_v1 }
  0xa2   :  { %v118_v28 = vadd.s32 %v117_v25, %v113_v3  ;;  %v305_v31 = vor.u32 %v304_v24, %v303_v18  ;;  %v311_v32 = vsel %vm309_vm9, %v299_v23, 2102212464  ;;  %vm308_vm10 = vcmp.lt.s32.totalorder %v287_v0, 3 }
  0xa3   :  { %v314_v33 = vsel %vm306_vm8, %v293_v20, %v296_v22  ;;  %v315_v34 = vsel %vm309_vm9, %v302_v27, 920167782  ;;  %v318_v35 = vsel %vm306_vm8, %v296_v22, %v299_v23  ;;  %vm307_vm11 = vcmp.lt.s32.totalorder %v287_v0, 2 }
  0xa4   :  { %v119_v36 = vadd.s32 536870912, %v118_v28  ;;  %v316_v37 = vsel %vm308_vm10, %v299_v23, %v315_v34  ;;  %v319_v38 = vsel %vm309_vm9, %v305_v31, 1326507024  ;;  %v310_v40 = vsel %vm306_vm8, %v290_v29, %v293_v20 }
  0xa5   :  { %v312_v41 = vsel %vm308_vm10, %v296_v22, %v311_v32  ;;  %v317_v42 = vsel %vm307_vm11, %v314_v33, %v316_v37  ;;  %v320_v43 = vsel %vm308_vm10, %v302_v27, %v319_v38  ;;  %v387_v55 = vadd.s32 1, %v1033_v2 }
  0xa6   :  { %v1500_v44 = vshrl.u32 %v119_v36, 30  ;;  %v321_v45 = vsel %vm307_vm11, %v318_v35, %v320_v43  ;;  %v1503_v49 = vmul.u32.u64.low %v1470_v51, %v317_v42  ;;  %v1504_v50 = vmul.u32.u64.high %v1470_v51, %v317_v42, %v1503_v49 }
  0xa7   :  { %v1508_v52 = vmul.u32.u64.low %v1470_v51, %v321_v45  ;;  %v1509_v53 = vmul.u32.u64.high %v1470_v51, %v321_v45, %v1508_v52  ;;  %v313_v58 = vsel %vm307_vm11, %v310_v40, %v312_v41  ;;  %v168_v62 = vand.u32 8388607, %v161_v10 }
  0xa8   :  { %v121_v57 = vshll.u32 %v1500_v44, 30  ;;  %v332_v1 = vadd.s32 1, %v1504_v50  ;;  %v179_v3 = vshrl.u32 %v1274_v17, %v1482_v63  ;;  %v329_v5 = vmul.u32 %v1470_v51, %v313_v58 }
  0xa9   :  { %vm331_vm12 = vc.u32 %v1509_v53, %v1503_v49  ;;  %vm388_vm13 = vcmp.gt.s32.totalorder %v387_v55, 0  ;;  %v182_v2 = vshrl.u32 %v1275_v19, %v1482_v63  ;;  %v169_v11 = vor.u32 8388608, %v168_v62 }
  0xaa   :  { %v1514_v0 = vsub.s32 %v118_v28, %v121_v57  ;;  %v333_v7 = vsel %vm331_vm12, %v332_v1, %v1504_v50  ;;  %v178_v13 = vshll.u32 %v1273_v15, %v1457_v12  ;;  %v174_v14 = vshrl.u32 %v1451_v4, 5 }
  0xab   :  { %v334_v16 = vadd.s32 %v333_v7, %v329_v5  ;;  %v181_v51 = vshll.u32 %v1274_v17, %v1457_v12  ;;  %v185_v9 = vshrl.u32 %v1276_v21, %v1482_v63  ;;  %v389_v18 = vsel %vm388_vm13, %v387_v55, 0 }
  0xac   :  { %v124_v6 = vsub.s32 0, %v1514_v0  ;;  %v180_v20 = vor.u32 %v179_v3, %v178_v13  ;;  %v184_v22 = vshll.u32 %v1275_v19, %v1457_v12  ;;  %v187_v25 = vshll.u32 %v1276_v21, %v1457_v12 }
  0xad   :  { %v335_v23 = vadd.s32 536870912, %v334_v16  ;;  %v183_v24 = vor.u32 %v182_v2, %v181_v51  ;;  %v188_v4 = vshrl.u32 %v1277_v26, %v1482_v63  ;;  %v191_v28 = vshrl.u32 %v1278_v30, %v1482_v63 }
  0xae   :  { %v1022_v8 = vmin.u32 %v124_v6, %v1514_v0  ;;  %v186_v31 = vor.u32 %v185_v9, %v184_v22  ;;  %v190_v33 = vshll.u32 %v1277_v26, %v1457_v12  ;;  %v391_v35 = vand.u32 31, %v389_v18 }
  0xaf   :  { %v1542_v29 = vshrl.u32 %v335_v23, 30  ;;  %v189_v32 = vor.u32 %v188_v4, %v187_v25  ;;  %vm193_vm14 = vcmp.lt.s32.totalorder %v174_v14, 1  ;;  %v209_v36 = vshll.u32 %v169_v11, 8 }
  0xb0   :  { %v126_v27 = vclz %v1022_v8  ;;  %v192_v38 = vor.u32 %v191_v28, %v190_v33  ;;  %vm196_vm15 = vcmp.lt.s32.totalorder %v174_v14, 4  ;;  %v201_v40 = vsel %vm193_vm14, %v180_v20, %v183_v24 }
  0xb1   :  { %v337_v37 = vshll.u32 %v1542_v29, 30  ;;  %vm194_vm1 = vcmp.lt.s32.totalorder %v174_v14, 2  ;;  %vm195_vm2 = vcmp.lt.s32.totalorder %v174_v14, 3  ;;  %v202_v41 = vsel %vm196_vm15, %v189_v32, 920167782 }
  0xb2   :  { %v1023_v34 = vadd.s32 4294967294, %v126_v27  ;;  %v198_v45 = vsel %vm196_vm15, %v186_v31, 2102212464  ;;  %v203_v12 = vsel %vm195_vm2, %v186_v31, %v202_v41  ;;  %v177_v52 = vshrl.u32 %v1273_v15, %v1482_v63 }
  0xb3   :  { %v1548_v43 = vsub.s32 %v334_v16, %v337_v37  ;;  %v204_v55 = vsel %vm194_vm1, %v201_v40, %v203_v12  ;;  %v205_v57 = vsel %vm193_vm14, %v183_v24, %v186_v31  ;;  %v206_v62 = vsel %vm196_vm15, %v192_v38, 1326507024 }
  0xb4   :  { %vm1024_vm0 = vcmp.lt.s32.totalorder %v1023_v34, 0  ;;  %v1556_v1 = vmul.u32.u64.low %v209_v36, %v204_v55  ;;  %v1557_v3 = vmul.u32.u64.high %v209_v36, %v204_v55, %v1556_v1  ;;  %v1560_v5 = vsub.s32 32, %v391_v35 }
  0xb5   :  { %v129_v42 = vsel %vm1024_vm0, 0, %v1023_v34  ;;  %v340_v58 = vsub.s32 0, %v1548_v43  ;;  %v197_v2 = vsel %vm193_vm14, %v177_v52, %v180_v20  ;;  %v199_v6 = vsel %vm195_vm2, %v183_v24, %v198_v45 }
  0xb6   :  { %v134_v50 = vsub.s32 4294967266, %v129_v42  ;;  %v207_v7 = vsel %vm195_vm2, %v189_v32, %v206_v62  ;;  %v200_v9 = vsel %vm194_vm1, %v197_v2, %v199_v6  ;;  %v219_v8 = vadd.s32 1, %v1557_v3 }
  0xb7   :  { %v208_v63 = vsel %vm194_vm1, %v205_v57, %v207_v7  ;;  %v1030_v13 = vmin.u32 %v340_v58, %v1548_v43  ;;  %v130_v22 = vsub.s32 32, %v129_v42  ;;  %v404_v20 = vshrl.u32 %v1277_v26, %v1560_v5 }
  0xb8   :  { %v135_v11 = vadd.s32 127, %v134_v50  ;;  %v1567_v16 = vmul.u32.u64.low %v209_v36, %v208_v63  ;;  %v1568_v51 = vmul.u32.u64.high %v209_v36, %v208_v63, %v1567_v16  ;;  %v114_v23 = vadd.s32 %v1477_v61, %v1474_v60 }
  0xb9   :  { %v403_v24 = vshll.u32 %v1276_v21, %v391_v35  ;;  %v407_v25 = vshrl.u32 %v1278_v30, %v1560_v5  ;;  %v377_v4 = vand.u32 2147483647, %v1444_v56  ;;  %v342_v28 = vclz %v1030_v13 }
  0xba   :  { %v136_v27 = vshll.u32 %v135_v11, 23  ;;  %v216_v14 = vmul.u32 %v209_v36, %v200_v9  ;;  %vm218_vm3 = vc.u32 %v1568_v51, %v1556_v1  ;;  %v406_v31 = vshll.u32 %v1277_v26, %v391_v35 }
  0xbb   :  { %v220_v32 = vsel %vm218_vm3, %v219_v8, %v1557_v3  ;;  %v132_v33 = vshrl.u32 %v114_v23, %v130_v22  ;;  %v390_v34 = vshrl.u32 %v389_v18, 5  ;;  %v405_v60 = vor.u32 %v404_v20, %v403_v24 }
  0xbc   :  { %v221_v61 = vadd.s32 %v220_v32, %v216_v14  ;;  %v131_v37 = vshll.u32 %v1514_v0, %v129_v42  ;;  %v408_v38 = vor.u32 %v407_v25, %v406_v31  ;;  %v384_v30 = vand.u32 8388607, %v377_v4 }
  0xbd   :  { %v395_v36 = vshrl.u32 %v1274_v17, %v1560_v5  ;;  %v137_v40 = vor.u32 4788187, %v136_v27  ;;  %v1031_v41 = vadd.s32 4294967294, %v342_v28  ;;  %v398_v26 = vshrl.u32 %v1275_v19, %v1560_v5 }
  0xbe   :  { %v222_v45 = vadd.s32 536870912, %v221_v61  ;;  %v394_v12 = vshll.u32 %v1273_v15, %v391_v35  ;;  %v397_v18 = vshll.u32 %v1274_v17, %v391_v35  ;;  %v400_v50 = vshll.u32 %v1275_v19, %v391_v35 }
  0xbf   :  { %v401_v0 = vshrl.u32 %v1276_v21, %v1560_v5  ;;  %v133_v42 = vor.u32 %v132_v33, %v131_v37  ;;  %vm412_vm4 = vcmp.lt.s32.totalorder %v390_v34, 4  ;;  %v138_v62 = vand.u32 2147483647, %v137_v40 }
  0xc0   :  { %v1596_v52 = vshrl.u32 %v222_v45, 30  ;;  %v396_v55 = vor.u32 %v395_v36, %v394_v12  ;;  %v399_v57 = vor.u32 %v398_v26, %v397_v18  ;;  %v418_v3 = vsel %vm412_vm4, %v405_v60, 920167782 }
  0xc1   :  { %v402_v58 = vor.u32 %v401_v0, %v400_v50  ;;  %vm1032_vm5 = vcmp.lt.s32.totalorder %v1031_v41, 0  ;;  %v422_v17 = vsel %vm412_vm4, %v408_v38, 1326507024  ;;  %v385_v6 = vor.u32 8388608, %v384_v30 }
  0xc2   :  { %v224_v2 = vshll.u32 %v1596_v52, 30  ;;  %v140_v19 = vcvt.s32.f32 %v133_v42  ;;  %vm409_vm6 = vcmp.lt.s32.totalorder %v390_v34, 1  ;;  %vm411_vm7 = vcmp.lt.s32.totalorder %v390_v34, 3 }
  0xc3   :  { %v417_v21 = vsel %vm409_vm6, %v396_v55, %v399_v57  ;;  %v419_v7 = vsel %vm411_vm7, %v402_v58, %v418_v3  ;;  %v345_v11 = vsel %vm1032_vm5, 0, %v1031_v41  ;;  %vm410_vm8 = vcmp.lt.s32.totalorder %v390_v34, 2 }
  0xc4   :  { %v225_v35 = vsub.s32 %v221_v61, %v224_v2  ;;  %v141_v63 = vmul.f32 %v140_v19, %v138_v62  ;;  %v414_v16 = vsel %vm412_vm4, %v402_v58, 2102212464  ;;  %v421_v9 = vsel %vm409_vm6, %v399_v57, %v402_v58 }
  0xc5   :  { %v423_v8 = vsel %vm411_vm7, %v405_v60, %v422_v17  ;;  %v425_v22 = vshll.u32 %v385_v6, 8  ;;  %v393_v23 = vshrl.u32 %v1273_v15, %v1560_v5  ;;  %v420_v24 = vsel %vm410_vm8, %v417_v21, %v419_v7 }
  0xc6   :  { %v227_v13 = vsub.s32 0, %v225_v35  ;;  %v424_v25 = vsel %vm410_vm8, %v421_v9, %v423_v8  ;;  %v350_v27 = vsub.s32 4294967266, %v345_v11  ;;  %v142_v31 = vxor.u32 2147483648, %v141_v63 }
  0xc7   :  { %v1610_v28 = vmul.u32.u64.low %v425_v22, %v424_v25  ;;  %v1611_v14 = vmul.u32.u64.high %v425_v22, %v424_v25, %v1610_v28  ;;  %v413_v33 = vsel %vm409_vm6, %v393_v23, %v396_v55  ;;  %v415_v61 = vsel %vm411_vm7, %v399_v57, %v414_v16 }
  0xc8   :  { %v1026_v20 = vmin.u32 %v227_v13, %v225_v35  ;;  %v1615_v60 = vmul.u32.u64.low %v425_v22, %v420_v24  ;;  %v1616_v37 = vmul.u32.u64.high %v425_v22, %v420_v24, %v1615_v60  ;;  %vm60_vm9 = vcmp.lt.s32.totalorder %v1433_v46, 0 }
  0xc9   :  { %v351_v15 = vadd.s32 127, %v350_v27  ;;  %v416_v5 = vsel %vm410_vm8, %v413_v33, %v415_v61  ;;  %v143_v30 = vsel %vm60_vm9, %v142_v31, %v141_v63  ;;  %v346_v36 = vsub.s32 32, %v345_v11 }
  0xca   :  { %v229_v32 = vclz %v1026_v20  ;;  %vm434_vm11 = vc.u32 %v1611_v14, %v1615_v60  ;;  %vm1627_vm12 = vcmp.le.f32.partialorder %v58_v48, 0.7853982  ;;  %v435_v45 = vadd.s32 1, %v1616_v37 }
  0xcb   :  { %v217_v34 = vadd.s32 %v1556_v1, %v1568_v51  ;;  %v432_v18 = vmul.u32 %v425_v22, %v416_v5  ;;  %v330_v50 = vadd.s32 %v1503_v49, %v1509_v53  ;;  %v352_v0 = vshll.u32 %v351_v15, 23 }
  0xcc   :  { %v1027_v38 = vadd.s32 4294967294, %v229_v32  ;;  %v146_v42 = vsel %vm1627_vm12, %v1433_v46, %v143_v30  ;;  %v436_v48 = vsel %vm434_vm11, %v435_v45, %v1616_v37  ;;  %v347_v17 = vshll.u32 %v1548_v43, %v345_v11 }
  0xcd   :  { %v437_v62 = vadd.s32 %v436_v48, %v432_v18  ;;  %v348_v3 = vshrl.u32 %v330_v50, %v346_v36  ;;  %v353_v6 = vor.u32 4788187, %v352_v0  ;;  %1227 = vcosq.f32 %v146_v42 }
  0xce   :  { %vm1028_vm10 = vcmp.lt.s32.totalorder %v1027_v38, 0  ;;  %1229 = vsinq.f32 %v146_v42  ;;  %v144_v21 = vsub.s32 4, %v1500_v44  ;;  %v247_v16 = vsub.s32 4, %v1596_v52 }
  0xcf   :  { %v232_v40 = vsel %vm1028_vm10, 0, %v1027_v38  ;;  %v438_v51 = vadd.s32 536870912, %v437_v62  ;;  %v349_v19 = vor.u32 %v348_v3, %v347_v17  ;;  %v354_v13 = vand.u32 2147483647, %v353_v6 }
  0xd0   :  { %v233_v26 = vsub.s32 32, %v232_v40  ;;  %v237_v12 = vsub.s32 4294967266, %v232_v40  ;;  %v234_v55 = vshll.u32 %v225_v35, %v232_v40  ;;  %v145_v43 = vsel %vm60_vm9, %v144_v21, %v1500_v44 }
  0xd1   :  { %v1641_v53 = vshrl.u32 %v438_v51, 30  ;;  %v356_v22 = vcvt.s32.f32 %v349_v19  ;;  %vm163_vm13 = vcmp.lt.s32.totalorder %v1435_v47, 0  ;;  %vm162_vm14 = vcmp.le.f32.partialorder %v161_v10, 0.7853982 }
  0xd2   :  { %v235_v57 = vshrl.u32 %v217_v34, %v233_v26  ;;  %v238_v58 = vadd.s32 127, %v237_v12  ;;  %v248_v24 = vsel %vm163_vm13, %v247_v16, %v1596_v52  ;;  %v147_v27 = vsel %vm1627_vm12, 0, %v145_v43 }
  0xd3   :  { %v440_v63 = vshll.u32 %v1641_v53, 30  ;;  %v357_v23 = vmul.f32 %v356_v22, %v354_v13  ;;  %v250_v44 = vsel %vm162_vm14, 0, %v248_v24  ;;  %v151_v38 = vand.u32 3, %v147_v27  ;;  %v1219_v13 = vld [vmem:[%s1757_s4 + $0x100] sm:$0xff]  }
  0xd4   :  { %v236_v2 = vor.u32 %v235_v57, %v234_v55  ;;  %v239_v1 = vshll.u32 %v238_v58, 23  ;;  %v254_v52 = vadd.s32 3, %v250_v44  ;;  %vm276_vm15 = vcmp.lt.s32.totalorder %v1440_v54, 0 }
  0xd5   :  { %v441_v8 = vsub.s32 %v437_v62, %v440_v63  ;;  %v358_v37 = vxor.u32 2147483648, %v357_v23  ;;  %vm153_vm1 = vcmp.eq.s32.totalorder %v151_v38, 0  ;;  %vm156_vm2 = vcmp.eq.s32.totalorder %v151_v38, 2 }
  0xd6   :  { %v240_v49 = vor.u32 4788187, %v239_v1  ;;  %v243_v35 = vcvt.s32.f32 %v236_v2  ;;  %v433_v40 = vadd.s32 %v1615_v60, %v1611_v14  ;;  %vm1663_vm3 = vcmp.le.f32.partialorder %v274_v59, 0.7853982 }
  0xd7   :  { %v443_v20 = vsub.s32 0, %v441_v8  ;;  %v1228_v31 = vpop.eup %1227  ;;  %v359_v10 = vsel %vm276_vm15, %v358_v37, %v357_v23  ;;  %v255_v26 = vand.u32 3, %v254_v52  ;;  %vm152_vm4 = vcmp.lt.s32.totalorder %v151_v38, 2 }
  0xd8   :  { %v241_v7 = vand.u32 2147483647, %v240_v49  ;;  %v1230_v33 = vpop.eup %1229  ;;  %v157_v30 = vxor.u32 2147483648, %v1228_v31  ;;  %v362_v50 = vsel %vm1663_vm3, %v1440_v54, %v359_v10  ;;  %vm150_vm5 = vweird.f32 %v1433_v46 }
  0xd9   :  { %v1034_v28 = vmin.u32 %v443_v20, %v441_v8  ;;  %v154_v5 = vxor.u32 2147483648, %v1230_v33  ;;  %vm260_vm6 = vcmp.eq.s32.totalorder %v255_v26, 2  ;;  %vm256_vm7 = vcmp.lt.s32.totalorder %v255_v26, 2 }
  0xda   :  { %v244_v9 = vmul.f32 %v243_v35, %v241_v7  ;;  %v158_v18 = vsel %vm156_vm2, %v157_v30, %v1230_v33  ;;  %vm257_vm8 = vcmp.eq.s32.totalorder %v255_v26, 0  ;;  %v360_v49 = vsub.s32 4, %v1542_v29  ;;  %v1222_v26 = vld [vmem:[%s1759_s6 + $0x8] sm:$0xff]  }
  0xdb   :  { %v445_v61 = vclz %v1034_v28  ;;  %v155_v12 = vsel %vm153_vm1, %v1228_v31, %v154_v5  ;;  %vm253_vm9 = vweird.f32 %v1435_v47  ;;  %v463_v46 = vsub.s32 4, %v1641_v53 }
  0xdc   :  { %v245_v11 = vxor.u32 2147483648, %v244_v9  ;;  %v159_v60 = vsel %vm152_vm4, %v155_v12, %v158_v18  ;;  %vm379_vm10 = vcmp.lt.s32.totalorder %v1444_v56, 0  ;;  %vm766_vm11 = vcmask 1043456   ;;  %v1224_v12 = vld [vmem:[%s1759_s6 + $0x18] sm:$0xff]   ;;  %v1225_v18 = vld [vmem:[%s1759_s6 + $0x20] sm:$0xff]  }
  0xdd   :  { %v1035_v15 = vadd.s32 4294967294, %v445_v61  ;;  %v160_v1 = vsel %vm150_vm5, nan, %v159_v60  ;;  %vm1686_vm12 = vcmp.le.f32.partialorder %v377_v4, 0.7853982  ;;  %v464_v43 = vsel %vm379_vm10, %v463_v46, %v1641_v53  ;;  %v481_v4 = vld [vmem:[%s1755_s2] sm:$0x3] }
  0xde   :  { %v246_v25 = vsel %vm163_vm13, %v245_v11, %v244_v9  ;;  %v482_v7 = vpack.c.bf16 %v160_v1, %v160_v1  ;;  %v361_v9 = vsel %vm276_vm15, %v360_v49, %v1542_v29  ;;  %vm1279_vm13 = vmmov 0  }
  0xdf   :  { %v249_v32 = vsel %vm162_vm14, %v1435_v47, %v246_v25  ;;  %vm1036_vm0 = vcmp.lt.s32.totalorder %v1035_v15, 0  ;;  %v1220_v47 = vld [vmem:[%s1757_s4 + $0x108] ss:$0 sps:$4 sm:$0xff]   ;;  %v363_v20 = vsel %vm1663_vm3, 0, %v361_v9  ;;  %v466_v24 = vsel %vm1686_vm12, 0, %v464_v43 }
  0xe0   :  { %1231 = vcosq.f32 %v249_v32  ;;  %v448_v36 = vsel %vm1036_vm0, 0, %v1035_v15  ;;  %v768_v53 = vsel %vm766_vm11, %v1220_v47, 0  ;;  %v367_v25 = vand.u32 3, %v363_v20  ;;  %v1081_v43 = vld [vmem:[%s1760_s7] ss:$0 sm:$0xff] }
  0xe1   :  { %1233 = vsinq.f32 %v249_v32  ;;  %v449_v41 = vsub.s32 32, %v448_v36  ;;  %v453_v45 = vsub.s32 4294967266, %v448_v36  ;;  %v450_v0 = vshll.u32 %v441_v8, %v448_v36 }
  0xe2   :  { %1235 = vcosq.f32 %v362_v50  ;;  %v486_v27 = vpack.c.bf16 %v481_v4, %v481_v4  ;;  %vm762_vm14 = vcmask 195584   ;;  %v470_v32 = vadd.s32 3, %v466_v24 }
  0xe3   :  { %v451_v42 = vshrl.u32 %v433_v40, %v449_v41  ;;  %v454_v48 = vadd.s32 127, %v453_v45  ;;  %1237 = vsinq.f32 %v362_v50  ;;  %vm369_vm15 = vcmp.eq.s32.totalorder %v367_v25, 0  ;;  %v1226_v50 = vld [vmem:[%s1759_s6 + $0x28] sm:$0xff]  }
  0xe4   :  { %vm372_vm0 = vcmp.eq.s32.totalorder %v367_v25, 2  ;;  %v471_v61 = vand.u32 3, %v470_v32  ;;  %vm368_vm1 = vcmp.lt.s32.totalorder %v367_v25, 2  ;;  %vm366_vm3 = vweird.f32 %v1440_v54  ;;  %v1221_v54 = vld [vmem:[%s1759_s6] sm:$0xff]  }
  0xe5   :  { %v452_v55 = vor.u32 %v451_v42, %v450_v0  ;;  %v455_v57 = vshll.u32 %v454_v48, 23 }
  0xe6   :  { %vm476_vm2 = vcmp.eq.s32.totalorder %v471_v61, 2  ;;  %vm473_vm4 = vcmp.eq.s32.totalorder %v471_v61, 0  ;;  %vm472_vm5 = vcmp.lt.s32.totalorder %v471_v61, 2 }
  0xe7   :  { %v456_v3 = vor.u32 4788187, %v455_v57  ;;  %v459_v6 = vcvt.s32.f32 %v452_v55 }
  0xe9   :  { %v457_v17 = vand.u32 2147483647, %v456_v3 }
  0xea   :  { %v1232_v14 = vpop.eup %1231 }
  0xeb   :  { %v1234_v58 = vpop.eup %1233  ;;  %v261_v59 = vxor.u32 2147483648, %v1232_v14  ;;  %v460_v35 = vmul.f32 %v459_v6, %v457_v17 }
  0xec   :  { %v258_v62 = vxor.u32 2147483648, %v1234_v58  ;;  %v1236_v11 = vpop.eup %1235 }
  0xed   :  { %v262_v2 = vsel %vm260_vm6, %v261_v59, %v1234_v58  ;;  %v461_v16 = vxor.u32 2147483648, %v460_v35  ;;  %v1238_v23 = vpop.eup %1237  ;;  %v373_v31 = vxor.u32 2147483648, %v1236_v11  ;;  %vm469_vm6 = vweird.f32 %v1444_v56 }
  0xee   :  { %v259_v51 = vsel %vm257_vm8, %v1232_v14, %v258_v62  ;;  %v370_v28 = vxor.u32 2147483648, %v1238_v23  ;;  %v1037_v62 = vld [vmem:[%s1758_s5] ss:$0 sm:$0xff]  ;;  %vm947_vm8 = vcmask 785408  }
  0xef   :  { %v263_v19 = vsel %vm256_vm7, %v259_v51, %v262_v2  ;;  %v462_v22 = vsel %vm379_vm10, %v461_v16, %v460_v35  ;;  %v374_v44 = vsel %vm372_vm0, %v373_v31, %v1238_v23  ;;  %vm35_vm7 = vcmask 254976  }
  0xf0   :  { %v264_v21 = vsel %vm253_vm9, nan, %v263_v19  ;;  %v465_v29 = vsel %vm1686_vm12, %v1444_v56, %v462_v22  ;;  %v371_v33 = vsel %vm369_vm15, %v1236_v11, %v370_v28  ;;  %36 = vst.msk [vmem:[#allocation2] sm:$0x3] %vm35_vm7, %v1272_v39  ;;  %v1223_v56 = vld [vmem:[%s1759_s6 + $0x10] sm:$0xff]  }
  0xf1   :  { %v483_v63 = vpack.c.bf16 %v264_v21, %v264_v21  ;;  %1239 = vcosq.f32 %v465_v29  ;;  %v375_v38 = vsel %vm368_vm1, %v371_v33, %v374_v44 }
  0xf2   :  { %1241 = vsinq.f32 %v465_v29  ;;  %v376_v10 = vsel %vm366_vm3, nan, %v375_v38 }
  0xf3   :  { %802 = vmatprep.mubr.bf16.mxu0 %v483_v63  ;;  %v484_v45 = vpack.c.bf16 %v376_v10, %v376_v10 }
  0xf4   :  { %803 = vmatmul.mubr.bf16.vlgmr.msra.gmra.mrb[0].mxu0 %v482_v7 }
  0xf5   :  { %1137 = vmatpush3.bf16.msra.mxu0 %v1219_v13  ;;  %1140 = vmatprep.mubr.msk.bf16.mxu0 %vm1279_vm13, %v1272_v39 }
  0xf6   :  { %1138 = vmatprep.subr.bf16.mxu0 %v1272_v39 }
  0xf7   :  { %v897_v13 = vld [vmem:[#allocation2] sm:$0x3] }
  0xf9   :  { %1139 = vmatpush3.bf16.msra.mxu0 %v768_v53 }
  0xfb   :  { %v1240_v37 = vpop.eup %1239 }
  0xfc   :  { %1141 = vmatmul.mubr.msk.bf16.vlgmr.msra.gmra.mrb[4].mxu0 %vm762_vm14, %v486_v27  ;;  %v1242_v15 = vpop.eup %1241  ;;  %v477_v52 = vxor.u32 2147483648, %v1240_v37 }
  0xfd   :  { %v474_v5 = vxor.u32 2147483648, %v1242_v15 }
  0xfe   :  { %v478_v30 = vsel %vm476_vm2, %v477_v52, %v1242_v15 }
  0xff   :  { %v475_v36 = vsel %vm473_vm4, %v1240_v37, %v474_v5 }
 0x100   :  { %v479_v40 = vsel %vm472_vm5, %v475_v36, %v478_v30 }
 0x101   :  { %v480_v41 = vsel %vm469_vm6, nan, %v479_v40 }
 0x102   :  { %v485_v34 = vpack.c.bf16 %v480_v41, %v480_v41 }
 0x104   :  { %842 = vmatprep.mubr.bf16.mxu1 %v485_v34 }
 0x105   :  { %843 = vmatmul.mubr.bf16.vlgmr.msra.gmra.mrb[0].mxu1 %v484_v45 }
 0x106   :  { %1156 = vmatprep.mubr.msk.bf16.mxu1 %vm1279_vm13, %v1272_v39  ;;  %1145 = vmatpush3.bf16.msra.mxu1 %v1221_v54 }
 0x107   :  { %1146 = vmatprep.subr.bf16.mxu1 %v1272_v39 }
 0x10a   :  { %1147 = vmatpush3.bf16.msra.mxu1 %v1222_v26 }
 0x10b   :  { %1148 = vmatprep.subr.bf16.mxu1 %v1272_v39 }
 0x10e   :  { %1149 = vmatpush3.bf16.msra.mxu1 %v1223_v56 }
 0x10f   :  { %1150 = vmatprep.subr.bf16.mxu1 %v1272_v39 }
 0x112   :  { %1151 = vmatpush3.bf16.msra.mxu1 %v1224_v12 }
 0x113   :  { %1152 = vmatprep.subr.bf16.mxu1 %v1272_v39 }
 0x116   :  { %1153 = vmatpush3.bf16.msra.mxu1 %v1225_v18 }
 0x117   :  { %1154 = vmatprep.subr.bf16.mxu1 %v1272_v39 }
 0x11a   :  { %1155 = vmatpush3.bf16.msra.mxu1 %v1226_v50 }
 0x1c7   :  { %v1098_v0 = vpop.f32.mrb[0].mxu0 }
 0x1c8   :  { %v1099_v42 = vpop.f32.mrb[1].mxu0 }
 0x1c9   :  { %v1100_v48 = vadd.f32 %v1099_v42, %v1098_v0  ;;  %v1101_v14 = vpop.f32.mrb[2].mxu0 }
 0x1ca   :  { %v1102_v60 = vpop.f32.mrb[3].mxu0 }
 0x1cb   :  { %v805_v1 = vadd.f32 %v1100_v48, %v1037_v62 }
 0x1cf   :  { %v884_v55 = vpop.f32.mrb[4].mxu0 }
 0x1d0   :  { %v1142_v57 = vpop.f32.mrb[5].mxu0 }
 0x1d1   :  { %v887_v58 = vpop.f32.mrb[6].mxu0 }
 0x1d2   :  { %v1143_v59 = vpop.f32.mrb[7].mxu0 }
 0x1d8   :  { %v1120_v3 = vpop.f32.mrb[0].mxu1 }
 0x1d9   :  { %v1121_v2 = vpop.f32.mrb[1].mxu1 }
 0x1da   :  { %v1122_v51 = vadd.f32 %v1121_v2, %v1120_v3  ;;  %v1123_v17 = vpop.f32.mrb[2].mxu1 }
 0x1db   :  { %v1124_v39 = vpop.f32.mrb[3].mxu1 }
 0x1dc   :  { %v845_v6 = vadd.f32 %v1122_v51, %v805_v1 }
 0x1de   :  { %v885_v49 = vadd.f32 %v884_v55, %v845_v6 }
 0x1e0   :  { %v1073_v19 = vmul.f32 -1.442695, %v885_v49 }
 0x1e2   :  { %1243 = vpow2.f32 %v1073_v19 }
 0x1ec   :  { %v1244_v21 = vpop.eup %1243 }
 0x1ed   :  { %v893_v7 = vadd.f32 1.0, %v1244_v21 }
 0x1ef   :  { %1245 = vrcp.f32 %v893_v7 }
 0x1f9   :  { %v1246_v35 = vpop.eup %1245 }
 0x1fa   :  { %v896_v46 = vmul.f32 %v1246_v35, %v885_v49 }
 0x1fc   :  { %v898_v63 = vpack.c.bf16 %v896_v46, %v896_v46 }
 0x1fe   :  { %1157 = vmatmul.mubr.msk.bf16.vlgmr.msra.gmra.mrb[4].mxu1 %vm947_vm8, %v898_v63 }
 0x2d1   :  { %v985_v16 = vpop.f32.mrb[4].mxu1 }
 0x2d2   :  { %v991_v9 = vadd.f32 %v985_v16, %v897_v13  ;;  %v1158_v47 = vpop.f32.mrb[5].mxu1 }
 0x2d3   :  { %v988_v8 = vpop.f32.mrb[6].mxu1 }
 0x2d4   :  { %993 = vst.msk [vmem:[#allocation2] sm:$0x3] %vm35_vm7, %v991_v9  ;;  %v1159_v22 = vpop.f32.mrb[7].mxu1 }
 0x2db   :  { %v997_v11 = vld [vmem:[#allocation2] sm:$0x3] }
 0x2dc   :  { %v1005_v29 = vadd.f32 %v1081_v43, %v997_v11 }
 0x2de   :  { %1006 = vst.msk [vmem:[#allocation3] sm:$0x3] %vm35_vm7, %v1005_v29 }
 0x2df   :  { %1258 = shalt.err (!%p1255_p4)
}
 0x2e0   :  { %s1259_s23 = scalar_lea.hbm %s1761_s8, 32 }
 0x2e1   :  { %p1260_p5 = scmp.ne.s32.totalorder %s1761_s8, %s1259_s23  ;;  %p1263_p6 = scmp.lt.u32.totalorder %s1259_s23, %s1761_s8 }
 0x2e3   :  { %p1265_p7 = pnand %p1263_p6, %p1260_p5 }
 0x2e5   :  { %1268 = shalt.err (!%p1265_p7)
}
 0x2e6   :  { %1016 = dma.vmem_to_hbm [thread:$0]  %s1014_s19, 32, %s1761_s8, [#allocation4]  }
 0x2e7   :  { %1269 = dma.done.wait [#allocation4], 32  }
 0x2e8   :  { %1270 = vsyncadd [#allocation4], 4294967264 }
 0x2e9   :  { %1020 = vsyncpa [#allocation4], 1 }

</bundles_post_ra>
